<compile_context>
chip_gen: v5e
topology: v5e:2x2
jax: 0.10.0
libtpu: 0.0.40
codegen_flags: <defaults>
</compile_context>

<pallas_src>
import functools

import jax
import jax.numpy as jnp
from jax.experimental import pallas as pl
from jax.experimental.pallas import tpu as pltpu

HIDDEN = 256            # fixed by the PyTorch module (layer1/layer2 out_features)
_MAX_BATCH_TILE = 1024  # keeps the double-buffered x/out tiles well under scoped VMEM


def _round_up(x, m):
    return ((x + m - 1) // m) * m


def _tensorcores_per_chip():
    """v7x exposes 2 TensorCores per chip (a 'parallel' grid axis shards across
    them); v5e/v6e have 1. Megacore chips (v4/v5p) also present 2 TCs."""
    try:
        kind = jax.devices()[0].device_kind.lower()
    except Exception:
        return 1
    for tag in ("v7", "v5p", "v4"):
        if tag in kind:
            return 2
    return 1


def _pick_batch_tile(batch, n_cores):
    """>= n_cores grid steps on multi-TC chips; one big step on single-TC chips."""
    full = _round_up(batch, 8)  # sublane multiple
    if n_cores > 1:
        bt = _round_up((batch + n_cores - 1) // n_cores, 8)
    else:
        bt = full
    return max(8, min(bt, full, _MAX_BATCH_TILE))


def _qnet_kernel(x_ref, w1_ref, b1_ref, w2_ref, b2_ref, w3_ref, b3_ref, o_ref):
    # Entire hot path fused, one batch tile per grid step. Matmul inputs in the
    # weights' dtype (bf16 by default, f32 if requested), accumulation in f32;
    # bias adds + ReLU stay in f32 (v5e VPU has no bf16 path).
    # NOTE: splitting the 256x256 f32 intermediates into 128-column halves (v5e
    # vst-slot relief) is intentionally not applied — the kernel is overhead-
    # bound at these shapes, per review.
    wdt = w1_ref.dtype
    x = x_ref[...].astype(wdt)
    h1 = jnp.dot(x, w1_ref[...], preferred_element_type=jnp.float32) + b1_ref[...]
    h1 = jnp.maximum(h1, 0.0).astype(wdt)
    h2 = jnp.dot(h1, w2_ref[...], preferred_element_type=jnp.float32) + b2_ref[...]
    h2 = jnp.maximum(h2, 0.0).astype(wdt)
    out = jnp.dot(h2, w3_ref[...], preferred_element_type=jnp.float32) + b3_ref[...]
    o_ref[...] = out.astype(o_ref.dtype)


@functools.partial(jax.jit, static_argnums=(2,))
def _qnetwork_forward_impl(x, params, bt):
    B, S = x.shape
    A = params["w3"].shape[1]
    grid = (pl.cdiv(B, bt),)

    def resident(shape):
        # Constant block index every grid step: a single buffer is enough
        # (no dead double buffer, no wasted second prefetch).
        return pl.BlockSpec(shape, lambda i: (0, 0), pipeline_mode=pl.Buffered(1))

    in_specs = [
        pl.BlockSpec((bt, S), lambda i: (i, 0)),   # x tile (pipelined over batch)
        resident((S, HIDDEN)),                     # w1
        resident((1, HIDDEN)),                     # b1
        resident((HIDDEN, HIDDEN)),                # w2
        resident((1, HIDDEN)),                     # b2
        resident((HIDDEN, A)),                     # w3 (A == full last dim -> legal)
        resident((1, A)),                          # b3
    ]
    out_specs = pl.BlockSpec((bt, A), lambda i: (i, 0))

    return pl.pallas_call(
        _qnet_kernel,
        out_shape=jax.ShapeDtypeStruct((B, A), jnp.float32),
        grid_spec=pl.GridSpec(grid=grid, in_specs=in_specs, out_specs=out_specs),
        compiler_params=pltpu.CompilerParams(
            dimension_semantics=("parallel",),  # batch axis shards across TCs on v7x
        ),
    )(
        x,
        params["w1"], params["b1"],
        params["w2"], params["b2"],
        params["w3"], params["b3"],
    )


def qnetwork_forward(x, params, *, batch_tile=None):
    """x: (B, state_size) f32. params: dict of w1,b1,w2,b2,w3,b3 (see init).
    Returns (B, action_size) f32 Q-values.

    The kernel is launch-overhead bound at DQN-sized shapes; for best
    throughput amortize the fixed cost by passing the largest batch you have
    (e.g. the whole replay minibatch, or online+target inputs concatenated
    when they share weights)."""
    if batch_tile is None:
        batch_tile = _pick_batch_tile(x.shape[0], _tensorcores_per_chip())
    return _qnetwork_forward_impl(x, params, int(batch_tile))


def init_qnetwork_params(key, state_size, action_size, *, param_dtype=jnp.bfloat16):
    """Deterministic init matching nn.Linear's default U(-1/sqrt(fan_in), 1/sqrt(fan_in)).

    Weights are stored transposed relative to PyTorch, (in_features, out_features).
    `param_dtype` is an explicit precision gate for the MXU inputs:
      * jnp.bfloat16 (default): fast path, ~1e-3 relative deviation from the
        f32 PyTorch module — fine for RL inference.
      * jnp.float32: PyTorch-faithful compute through the same kernel.
    Biases are kept in f32 (added after the f32-accumulated matmul)."""
    def linear(key, fan_in, fan_out):
        kw, kb = jax.random.split(key)
        bound = 1.0 / jnp.sqrt(float(fan_in))
        w = jax.random.uniform(kw, (fan_in, fan_out), jnp.float32, -bound, bound)
        b = jax.random.uniform(kb, (1, fan_out), jnp.float32, -bound, bound)
        return w.astype(param_dtype), b

    k1, k2, k3 = jax.random.split(key, 3)
    w1, b1 = linear(k1, state_size, HIDDEN)
    w2, b2 = linear(k2, HIDDEN, HIDDEN)
    w3, b3 = linear(k3, HIDDEN, action_size)
    return {"w1": w1, "b1": b1, "w2": w2, "b2": b2, "w3": w3, "b3": b3}


def qnetwork_reference(x, params):
    """Pure-JAX reference mirroring the kernel's compute (inputs cast to the
    weights' dtype, f32 accumulation)."""
    wdt = params["w1"].dtype
    h1 = jnp.dot(x.astype(wdt), params["w1"],
                 preferred_element_type=jnp.float32) + params["b1"]
    h1 = jnp.maximum(h1, 0.0)
    h2 = jnp.dot(h1.astype(wdt), params["w2"],
                 preferred_element_type=jnp.float32) + params["b2"]
    h2 = jnp.maximum(h2, 0.0)
    return jnp.dot(h2.astype(wdt), params["w3"],
                   preferred_element_type=jnp.float32) + params["b3"]


if __name__ == "__main__":
    STATE_SIZE = 8    # e.g. LunarLander-v2 observation dim
    ACTION_SIZE = 4   # e.g. LunarLander-v2 action dim
    BATCH = 64        # small demo batch; tile picker splits it across TCs on v7x

    key = jax.random.PRNGKey(0)
    kx, kp = jax.random.split(key)
    x = jax.random.normal(kx, (BATCH, STATE_SIZE), jnp.float32)

    # Default (bf16 MXU-input) path.
    params = init_qnetwork_params(kp, STATE_SIZE, ACTION_SIZE)
    q = qnetwork_forward(x, params)
    jax.block_until_ready(q)
    assert q.shape == (BATCH, ACTION_SIZE), q.shape
    q_ref = qnetwork_reference(x, params)
    assert jnp.allclose(q, q_ref, atol=1e-4, rtol=1e-4), "bf16 path mismatch vs JAX reference"

    # Explicitly gated f32 (PyTorch-faithful) path through the same kernel.
    params_f32 = init_qnetwork_params(kp, STATE_SIZE, ACTION_SIZE, param_dtype=jnp.float32)
    q32 = qnetwork_forward(x, params_f32)
    jax.block_until_ready(q32)
    q32_ref = qnetwork_reference(x, params_f32)
    assert jnp.allclose(q32, q32_ref, atol=5e-2, rtol=5e-2), "f32 path mismatch vs JAX reference"

    print("KERNEL_OK")
</pallas_src>

<mosaic_0001>
module attributes {stable_mosaic.version = 11 : i64} {
  func.func @_qnet_kernel(%arg0: i32, %arg1: memref<64x8xf32, #tpu.memory_space<vmem>>, %arg2: memref<8x256xbf16, #tpu.memory_space<vmem>>, %arg3: memref<1x256xf32, #tpu.memory_space<vmem>>, %arg4: memref<256x256xbf16, #tpu.memory_space<vmem>>, %arg5: memref<1x256xf32, #tpu.memory_space<vmem>>, %arg6: memref<256x4xbf16, #tpu.memory_space<vmem>>, %arg7: memref<1x4xf32, #tpu.memory_space<vmem>>, %arg8: memref<64x4xf32, #tpu.memory_space<vmem>>) attributes {dimension_semantics = [#tpu.dimension_semantics<parallel>], iteration_bounds = array<i64: 1>, scalar_prefetch = 0 : i64, scratch_operands = 0 : i64, tpu.core_type = #tpu.core_type<tc>, window_params = [{transform_indices = @transform_0, window_bounds = array<i64: 64, 8>}, {pipeline_mode = #tpu.pipeline_mode<synchronous>, transform_indices = @transform_1, window_bounds = array<i64: 8, 256>}, {pipeline_mode = #tpu.pipeline_mode<synchronous>, transform_indices = @transform_2, window_bounds = array<i64: 1, 256>}, {pipeline_mode = #tpu.pipeline_mode<synchronous>, transform_indices = @transform_3, window_bounds = array<i64: 256, 256>}, {pipeline_mode = #tpu.pipeline_mode<synchronous>, transform_indices = @transform_4, window_bounds = array<i64: 1, 256>}, {pipeline_mode = #tpu.pipeline_mode<synchronous>, transform_indices = @transform_5, window_bounds = array<i64: 256, 4>}, {pipeline_mode = #tpu.pipeline_mode<synchronous>, transform_indices = @transform_6, window_bounds = array<i64: 1, 4>}, {transform_indices = @transform_7, window_bounds = array<i64: 64, 4>}]} {
    %c0 = arith.constant 0 : index
    %c0_0 = arith.constant 0 : index
    %0 = vector.load %arg1[%c0, %c0_0] : memref<64x8xf32, #tpu.memory_space<vmem>>, vector<64x8xf32>
    %1 = arith.truncf %0 : vector<64x8xf32> to vector<64x8xbf16>
    %c0_1 = arith.constant 0 : index
    %c0_2 = arith.constant 0 : index
    %2 = vector.load %arg2[%c0_1, %c0_2] : memref<8x256xbf16, #tpu.memory_space<vmem>>, vector<8x256xbf16>
    %cst = arith.constant dense<0.000000e+00> : vector<64x256xf32>
    %3 = tpu.matmul %1, %2, %cst {dimension_numbers = #tpu.dot_dimension_numbers<[1], [0], [0], [1], [0, 0, 1, 1], [], []>} : vector<64x8xbf16>, vector<8x256xbf16>, vector<64x256xf32> -> vector<64x256xf32>
    %c0_3 = arith.constant 0 : index
    %c0_4 = arith.constant 0 : index
    %4 = vector.load %arg3[%c0_3, %c0_4] : memref<1x256xf32, #tpu.memory_space<vmem>>, vector<1x256xf32>
    %5 = vector.broadcast %4 : vector<1x256xf32> to vector<64x256xf32>
    %6 = arith.addf %3, %5 : vector<64x256xf32>
    %cst_5 = arith.constant 0.000000e+00 : f32
    %7 = vector.broadcast %cst_5 : f32 to vector<64x256xf32>
    %8 = arith.maximumf %6, %7 : vector<64x256xf32>
    %9 = arith.truncf %8 : vector<64x256xf32> to vector<64x256xbf16>
    %c0_6 = arith.constant 0 : index
    %c0_7 = arith.constant 0 : index
    %10 = vector.load %arg4[%c0_6, %c0_7] : memref<256x256xbf16, #tpu.memory_space<vmem>>, vector<256x256xbf16>
    %cst_8 = arith.constant dense<0.000000e+00> : vector<64x256xf32>
    %11 = tpu.matmul %9, %10, %cst_8 {dimension_numbers = #tpu.dot_dimension_numbers<[1], [0], [0], [1], [0, 0, 1, 1], [], []>} : vector<64x256xbf16>, vector<256x256xbf16>, vector<64x256xf32> -> vector<64x256xf32>
    %c0_9 = arith.constant 0 : index
    %c0_10 = arith.constant 0 : index
    %12 = vector.load %arg5[%c0_9, %c0_10] : memref<1x256xf32, #tpu.memory_space<vmem>>, vector<1x256xf32>
    %13 = vector.broadcast %12 : vector<1x256xf32> to vector<64x256xf32>
    %14 = arith.addf %11, %13 : vector<64x256xf32>
    %cst_11 = arith.constant 0.000000e+00 : f32
    %15 = vector.broadcast %cst_11 : f32 to vector<64x256xf32>
    %16 = arith.maximumf %14, %15 : vector<64x256xf32>
    %17 = arith.truncf %16 : vector<64x256xf32> to vector<64x256xbf16>
    %c0_12 = arith.constant 0 : index
    %c0_13 = arith.constant 0 : index
    %18 = vector.load %arg6[%c0_12, %c0_13] : memref<256x4xbf16, #tpu.memory_space<vmem>>, vector<256x4xbf16>
    %cst_14 = arith.constant dense<0.000000e+00> : vector<64x4xf32>
    %19 = tpu.matmul %17, %18, %cst_14 {dimension_numbers = #tpu.dot_dimension_numbers<[1], [0], [0], [1], [0, 0, 1, 1], [], []>} : vector<64x256xbf16>, vector<256x4xbf16>, vector<64x4xf32> -> vector<64x4xf32>
    %c0_15 = arith.constant 0 : index
    %c0_16 = arith.constant 0 : index
    %20 = vector.load %arg7[%c0_15, %c0_16] : memref<1x4xf32, #tpu.memory_space<vmem>>, vector<1x4xf32>
    %21 = vector.broadcast %20 : vector<1x4xf32> to vector<64x4xf32>
    %22 = arith.addf %19, %21 : vector<64x4xf32>
    %c0_17 = arith.constant 0 : index
    %c0_18 = arith.constant 0 : index
    %23 = vector.load %arg8[%c0_17, %c0_18] : memref<64x4xf32, #tpu.memory_space<vmem>>, vector<64x4xf32>
    tpu.vector_store %arg8[%c0_17, %c0_18], %22 {strides = array<i32>} : memref<64x4xf32, #tpu.memory_space<vmem>>, vector<64x4xf32>,
    return
  }
  func.func @transform_0(%arg0: i32) -> (i32, i32) {
    %c0_i32 = arith.constant 0 : i32
    %c0_i32_0 = arith.constant 0 : i32
    return %arg0, %c0_i32 : i32, i32
  }
  func.func @transform_1(%arg0: i32) -> (i32, i32) {
    %c0_i32 = arith.constant 0 : i32
    %c0_i32_0 = arith.constant 0 : i32
    %c0_i32_1 = arith.constant 0 : i32
    return %c0_i32, %c0_i32_0 : i32, i32
  }
  func.func @transform_2(%arg0: i32) -> (i32, i32) {
    %c0_i32 = arith.constant 0 : i32
    %c0_i32_0 = arith.constant 0 : i32
    %c0_i32_1 = arith.constant 0 : i32
    return %c0_i32, %c0_i32_0 : i32, i32
  }
  func.func @transform_3(%arg0: i32) -> (i32, i32) {
    %c0_i32 = arith.constant 0 : i32
    %c0_i32_0 = arith.constant 0 : i32
    %c0_i32_1 = arith.constant 0 : i32
    return %c0_i32, %c0_i32_0 : i32, i32
  }
  func.func @transform_4(%arg0: i32) -> (i32, i32) {
    %c0_i32 = arith.constant 0 : i32
    %c0_i32_0 = arith.constant 0 : i32
    %c0_i32_1 = arith.constant 0 : i32
    return %c0_i32, %c0_i32_0 : i32, i32
  }
  func.func @transform_5(%arg0: i32) -> (i32, i32) {
    %c0_i32 = arith.constant 0 : i32
    %c0_i32_0 = arith.constant 0 : i32
    %c0_i32_1 = arith.constant 0 : i32
    return %c0_i32, %c0_i32_0 : i32, i32
  }
  func.func @transform_6(%arg0: i32) -> (i32, i32) {
    %c0_i32 = arith.constant 0 : i32
    %c0_i32_0 = arith.constant 0 : i32
    %c0_i32_1 = arith.constant 0 : i32
    return %c0_i32, %c0_i32_0 : i32, i32
  }
  func.func @transform_7(%arg0: i32) -> (i32, i32) {
    %c0_i32 = arith.constant 0 : i32
    %c0_i32_0 = arith.constant 0 : i32
    return %arg0, %c0_i32 : i32, i32
  }
}

</mosaic_0001>

<bundles_post_ra>
// kernel: _qnetwork_forward_impl.1
= control target key start
LH: loop header
LB: loop body
LE: loop exit
PB: predicated region body
PF: predicated region fallthrough
CT: control target
= control target key end

     0   :  { %12 = vsyncpa [#allocation3], 0  ;;  %s989_s27 = smov [#allocation2]   ;;  %s990_s29 = smov 128   ;;  %s1199_s0 = inlined_call_operand.vmem [shape: f32[64,8], index: 0, kind: input, shape index: {}]   ;;  %s1200_s1 = inlined_call_operand.vmem [shape: bf16[8,256], index: 1, kind: input, shape index: {}]   ;;  %s1201_s2 = inlined_call_operand.vmem [shape: f32[1,256], index: 2, kind: input, shape index: {}]   ;;  %s1202_s3 = inlined_call_operand.hbm [shape: bf16[256,256], index: 3, kind: input, shape index: {}]   ;;  %s1203_s4 = inlined_call_operand.vmem [shape: f32[1,256], index: 4, kind: input, shape index: {}]   ;;  %s1204_s5 = inlined_call_operand.vmem [shape: bf16[256,4], index: 5, kind: input, shape index: {}]   ;;  %s1205_s6 = inlined_call_operand.vmem [shape: f32[1,4], index: 6, kind: input, shape index: {}]   ;;  %s1206_s7 = inlined_call_operand.vmem [shape: f32[64,4], index: 7, kind: output, shape index: {}]  }
   0x1   :  { %s23_s26 = sshll.u32 %s1202_s3, 4  ;;  %s25_s28 = sshll.u32 %s989_s27, 4  ;;  %s24_s26 = int_to_ptr.hbm [resolvable:$true] %s23_s26  ;;  %s26_s28 = int_to_ptr.vmem [resolvable:$true] %s25_s28 }
   0x2   :  { %s991_s30 = smov 8  }
   0x3   :  { %31 = dma.hbm_to_vmem [thread:$0]  %s24_s26, 4096, %s26_s28, [#allocation3], %s990_s29, %s990_s29, %s991_s30  }
   0x4   :  { %987 = dma.done.wait [#allocation3], 4096  }
   0x5   :  { %988 = vsyncadd [#allocation3], 4294963200  ;;  %v55_v0 = vld [vmem:[%s1200_s1] sm:$0xff]  ;;  %vm80_vm0 = vcmask 1043456   ;;  %v44_v4 = vld [vmem:[%s1199_s0 + $0x8] sm:$0xff]  ;;  %vm67_vm1 = vcmask 64512  }
   0x6   :  { %v63_v1 = vunpack.c.l.b16 %v55_v0  ;;  %v64_v2 = vunpack.c.h.b16 %v55_v0  ;;  %v43_v3 = vld [vmem:[%s1199_s0] sm:$0xff]  ;;  %v45_v10 = vld [vmem:[%s1199_s0 + $0x10] sm:$0xff]  ;;  %v46_v11 = vld [vmem:[%s1199_s0 + $0x18] sm:$0xff]  ;;  %vm697_vm2 = vcmask 31744  }
   0x7   :  { %v51_v9 = vpack.c.bf16 %v44_v4, %v43_v3  ;;  %v52_v12 = vpack.c.bf16 %v46_v11, %v45_v10  ;;  %v925_v13 = vld [vmem:[#allocation2 + $0x74] sm:$0xf]  ;;  %v779_v14 = vld [vmem:[#allocation2 + $0x78] sm:$0xf0]  ;;  %v923_v18 = vld [vmem:[#allocation2 + $0x64] sm:$0xf] }
   0x8   :  { %v65_v5 = vpack.c.b16 %v63_v1, %v63_v1  ;;  %v66_v6 = vpack.c.b16 %v64_v2, %v64_v2  ;;  %v941_v15 = vld [vmem:[#allocation2 + $0xf4] sm:$0xf]  ;;  %v782_v16 = vor.u32 %v925_v13, %v779_v14  ;;  %v843_v17 = vld [vmem:[#allocation2 + $0xf8] sm:$0xf0]  ;;  %v771_v19 = vld [vmem:[#allocation2 + $0x68] sm:$0xf0] }
   0x9   :  { %v846_v20 = vor.u32 %v941_v15, %v843_v17  ;;  %v939_v21 = vld [vmem:[#allocation2 + $0xe4] sm:$0xf]  ;;  %v835_v22 = vld [vmem:[#allocation2 + $0xe8] sm:$0xf0]  ;;  %v774_v23 = vor.u32 %v923_v18, %v771_v19  ;;  %v921_v24 = vld [vmem:[#allocation2 + $0x54] sm:$0xf] }
   0xa   :  { %v82_v7 = vsel %vm80_vm0, %v65_v5, 0  ;;  %v85_v8 = vsel %vm80_vm0, %v66_v6, 0  ;;  %v763_v25 = vld [vmem:[#allocation2 + $0x58] sm:$0xf0]  ;;  %v838_v26 = vor.u32 %v939_v21, %v835_v22  ;;  %v937_v27 = vld [vmem:[#allocation2 + $0xd4] sm:$0xf] }
   0xb   :  { %94 = vmatpush.bf16.msra.mxu0 %v82_v7  ;;  %123 = vmatpush.bf16.msra.mxu1 %v85_v8  ;;  %v827_v28 = vld [vmem:[#allocation2 + $0xd8] sm:$0xf0]  ;;  %v777_v29 = vld [vmem:[#allocation2 + $0x70] sm:$0xf]  ;;  %v926_v30 = vld [vmem:[#allocation2 + $0x74] sm:$0xf0]  ;;  %v766_v36 = vor.u32 %v921_v24, %v763_v25 }
   0xc   :  { %v841_v31 = vld [vmem:[#allocation2 + $0xf0] sm:$0xf]  ;;  %v942_v32 = vld [vmem:[#allocation2 + $0xf4] sm:$0xf0]  ;;  %v778_v33 = vor.u32 %v926_v30, %v777_v29  ;;  %v769_v35 = vld [vmem:[#allocation2 + $0x60] sm:$0xf]  ;;  %v830_v40 = vor.u32 %v937_v27, %v827_v28 }
   0xd   :  { %v842_v34 = vor.u32 %v942_v32, %v841_v31  ;;  %v924_v37 = vld [vmem:[#allocation2 + $0x64] sm:$0xf0]  ;;  %v833_v38 = vld [vmem:[#allocation2 + $0xe0] sm:$0xf]  ;;  %v919_v41 = vld [vmem:[#allocation2 + $0x44] sm:$0xf] }
   0xe   :  { %711 = vmatmul.msk.bf16.vlgmr.msra.gmra.mxu0 %vm67_vm1, %v51_v9  ;;  %715 = vmatmul.msk.bf16.vlgmr.msra.gmra.mxu1 %vm67_vm1, %v51_v9  ;;  %v940_v39 = vld [vmem:[#allocation2 + $0xe4] sm:$0xf0]  ;;  %v755_v42 = vld [vmem:[#allocation2 + $0x48] sm:$0xf0]  ;;  %v770_v43 = vor.u32 %v924_v37, %v769_v35  ;;  %v47_v44 = vld [vmem:[%s1199_s0 + $0x20] sm:$0xff] }
   0xf   :  { %425 = vmatpush.bf16.msrb.mxu0 %v782_v16  ;;  %454 = vmatpush.bf16.msrb.mxu1 %v846_v20  ;;  %v48_v45 = vld [vmem:[%s1199_s0 + $0x28] sm:$0xff]  ;;  %v935_v46 = vld [vmem:[#allocation2 + $0xc4] sm:$0xf]  ;;  %v834_v47 = vor.u32 %v940_v39, %v833_v38  ;;  %v761_v49 = vld [vmem:[#allocation2 + $0x50] sm:$0xf]  ;;  %v758_v51 = vor.u32 %v919_v41, %v755_v42 }
  0x10   :  { %367 = vmatpush.bf16.msra.mxu2 %v778_v33  ;;  %396 = vmatpush.bf16.msra.mxu3 %v842_v34  ;;  %v819_v48 = vld [vmem:[#allocation2 + $0xc8] sm:$0xf0]  ;;  %v922_v50 = vld [vmem:[#allocation2 + $0x54] sm:$0xf0]  ;;  %v825_v52 = vld [vmem:[#allocation2 + $0xd0] sm:$0xf]  ;;  %v53_v54 = vpack.c.bf16 %v48_v45, %v47_v44 }
  0x11   :  { %v938_v53 = vld [vmem:[#allocation2 + $0xd4] sm:$0xf0]  ;;  %v917_v55 = vld [vmem:[#allocation2 + $0x34] sm:$0xf]  ;;  %v747_v56 = vld [vmem:[#allocation2 + $0x38] sm:$0xf0]  ;;  %v822_v57 = vor.u32 %v935_v46, %v819_v48  ;;  %v762_v58 = vor.u32 %v922_v50, %v761_v49 }
  0x12   :  { %v933_v59 = vld [vmem:[#allocation2 + $0xb4] sm:$0xf]  ;;  %v826_v60 = vor.u32 %v938_v53, %v825_v52  ;;  %v811_v61 = vld [vmem:[#allocation2 + $0xb8] sm:$0xf0]  ;;  %v753_v62 = vld [vmem:[#allocation2 + $0x40] sm:$0xf]  ;;  %v750_v0 = vor.u32 %v917_v55, %v747_v56 }
  0x13   :  { %426 = vmatpush.bf16.msrb.mxu0 %v774_v23  ;;  %455 = vmatpush.bf16.msrb.mxu1 %v838_v26  ;;  %v920_v63 = vld [vmem:[#allocation2 + $0x44] sm:$0xf0]  ;;  %v817_v1 = vld [vmem:[#allocation2 + $0xc0] sm:$0xf]  ;;  %v915_v3 = vld [vmem:[#allocation2 + $0x24] sm:$0xf]  ;;  %v814_v5 = vor.u32 %v933_v59, %v811_v61 }
  0x14   :  { %368 = vmatpush.bf16.msra.mxu2 %v770_v43  ;;  %397 = vmatpush.bf16.msra.mxu3 %v834_v47  ;;  %v936_v2 = vld [vmem:[#allocation2 + $0xc4] sm:$0xf0]  ;;  %v739_v4 = vld [vmem:[#allocation2 + $0x28] sm:$0xf0]  ;;  %v754_v6 = vor.u32 %v920_v63, %v753_v62  ;;  %v49_v9 = vld [vmem:[%s1199_s0 + $0x30] sm:$0xff] }
  0x15   :  { %v818_v7 = vor.u32 %v936_v2, %v817_v1  ;;  %v742_v8 = vor.u32 %v915_v3, %v739_v4  ;;  %v50_v10 = vld [vmem:[%s1199_s0 + $0x38] sm:$0xff]  ;;  %v809_v14 = vld [vmem:[#allocation2 + $0xb0] sm:$0xf]  ;;  %v931_v18 = vld [vmem:[#allocation2 + $0xa4] sm:$0xf] }
  0x16   :  { %v54_v11 = vpack.c.bf16 %v50_v10, %v49_v9  ;;  %v918_v13 = vld [vmem:[#allocation2 + $0x34] sm:$0xf0]  ;;  %v803_v19 = vld [vmem:[#allocation2 + $0xa8] sm:$0xf0]  ;;  %v737_v21 = vld [vmem:[#allocation2 + $0x20] sm:$0xf] }
  0x17   :  { %427 = vmatpush.bf16.msrb.mxu0 %v766_v36  ;;  %456 = vmatpush.bf16.msrb.mxu1 %v830_v40  ;;  %v934_v16 = vld [vmem:[#allocation2 + $0xb4] sm:$0xf0]  ;;  %v806_v20 = vor.u32 %v931_v18, %v803_v19  ;;  %v916_v22 = vld [vmem:[#allocation2 + $0x24] sm:$0xf0]  ;;  %v801_v23 = vld [vmem:[#allocation2 + $0xa0] sm:$0xf] }
  0x18   :  { %369 = vmatpush.bf16.msra.mxu2 %v762_v58  ;;  %398 = vmatpush.bf16.msra.mxu3 %v826_v60  ;;  %v810_v17 = vor.u32 %v934_v16, %v809_v14  ;;  %v738_v24 = vor.u32 %v916_v22, %v737_v21  ;;  %v932_v25 = vld [vmem:[#allocation2 + $0xa4] sm:$0xf0]  ;;  %v913_v26 = vld [vmem:[#allocation2 + $0x14] sm:$0xf]  ;;  %v731_v27 = vld [vmem:[#allocation2 + $0x18] sm:$0xf0] }
  0x19   :  { %v802_v28 = vor.u32 %v932_v25, %v801_v23  ;;  %v734_v29 = vor.u32 %v913_v26, %v731_v27  ;;  %v729_v30 = vld [vmem:[#allocation2 + $0x10] sm:$0xf]  ;;  %v914_v31 = vld [vmem:[#allocation2 + $0x14] sm:$0xf0]  ;;  %v929_v35 = vld [vmem:[#allocation2 + $0x94] sm:$0xf] }
  0x1a   :  { %v793_v32 = vld [vmem:[#allocation2 + $0x90] sm:$0xf]  ;;  %v730_v33 = vor.u32 %v914_v31, %v729_v30  ;;  %v930_v34 = vld [vmem:[#allocation2 + $0x94] sm:$0xf0]  ;;  %v795_v36 = vld [vmem:[#allocation2 + $0x98] sm:$0xf0] }
  0x1b   :  { %428 = vmatpush.bf16.msrb.mxu0 %v758_v51  ;;  %457 = vmatpush.bf16.msrb.mxu1 %v822_v57  ;;  %v794_v37 = vor.u32 %v930_v34, %v793_v32  ;;  %v798_v38 = vor.u32 %v929_v35, %v795_v36  ;;  %v721_v39 = vld [vmem:[#allocation2] sm:$0xf]  ;;  %v912_v40 = vld [vmem:[#allocation2 + $0x4] sm:$0xf0]  ;;  %v911_v44 = vld [vmem:[#allocation2 + $0x4] sm:$0xf] }
  0x1c   :  { %370 = vmatpush.bf16.msra.mxu2 %v754_v6  ;;  %399 = vmatpush.bf16.msra.mxu3 %v818_v7  ;;  %v785_v41 = vld [vmem:[#allocation2 + $0x80] sm:$0xf]  ;;  %v722_v42 = vor.u32 %v912_v40, %v721_v39  ;;  %v928_v43 = vld [vmem:[#allocation2 + $0x84] sm:$0xf0]  ;;  %v723_v45 = vld [vmem:[#allocation2 + $0x8] sm:$0xf0] }
  0x1d   :  { %v786_v46 = vor.u32 %v928_v43, %v785_v41  ;;  %v726_v47 = vor.u32 %v911_v44, %v723_v45  ;;  %v927_v48 = vld [vmem:[#allocation2 + $0x84] sm:$0xf]  ;;  %v787_v49 = vld [vmem:[#allocation2 + $0x88] sm:$0xf0]  ;;  %v56_v51 = vld [vmem:[%s1201_s2] sm:$0x3] }
  0x1e   :  { %712 = vmatmul.msk.bf16.gmra.mxu0 %vm67_vm1, %v52_v12  ;;  %716 = vmatmul.msk.bf16.gmra.mxu1 %vm67_vm1, %v52_v12  ;;  %v745_v12 = vld [vmem:[#allocation2 + $0x30] sm:$0xf]  ;;  %v790_v50 = vor.u32 %v927_v48, %v787_v49  ;;  %v1075_v55 = vperm.slane %v56_v51, 1  ;;  %v958_v21 = vld [vmem:[%s1204_s5 + $0x78] sm:$0xff]  ;;  %v956_v25 = vld [vmem:[%s1204_s5 + $0x68] sm:$0xff] }
  0x1f   :  { %429 = vmatpush.bf16.msrb.mxu0 %v750_v0  ;;  %458 = vmatpush.bf16.msrb.mxu1 %v814_v5  ;;  %v746_v15 = vor.u32 %v918_v13, %v745_v12  ;;  %v949_v22 = vld [vmem:[%s1204_s5 + $0x30] sm:$0xff]  ;;  %v947_v32 = vld [vmem:[%s1204_s5 + $0x20] sm:$0xff]  ;;  %v946_v40 = vld [vmem:[%s1204_s5 + $0x18] sm:$0xff] }
  0x20   :  { %400 = vmatpush.bf16.msra.mxu3 %v810_v17  ;;  %v957_v23 = vld [vmem:[%s1204_s5 + $0x70] sm:$0xff]  ;;  %v954_v41 = vld [vmem:[%s1204_s5 + $0x58] sm:$0xff] }
  0x21   :  { %371 = vmatpush.bf16.msra.mxu2 %v746_v15  ;;  %v945_v44 = vld [vmem:[%s1204_s5 + $0x10] sm:$0xff] }
  0x23   :  { %430 = vmatpush.bf16.msrb.mxu0 %v742_v8  ;;  %459 = vmatpush.bf16.msrb.mxu1 %v806_v20  ;;  %v950_v20 = vld [vmem:[%s1204_s5 + $0x38] sm:$0xff] }
  0x24   :  { %401 = vmatpush.bf16.msra.mxu3 %v802_v28 }
  0x25   :  { %372 = vmatpush.bf16.msra.mxu2 %v738_v24  ;;  %v948_v24 = vld [vmem:[%s1204_s5 + $0x28] sm:$0xff] }
  0x27   :  { %431 = vmatpush.bf16.msrb.mxu0 %v734_v29  ;;  %460 = vmatpush.bf16.msrb.mxu1 %v798_v38 }
  0x28   :  { %402 = vmatpush.bf16.msra.mxu3 %v794_v37 }
  0x29   :  { %373 = vmatpush.bf16.msra.mxu2 %v730_v33  ;;  %v955_v33 = vld [vmem:[%s1204_s5 + $0x60] sm:$0xff] }
  0x2b   :  { %432 = vmatpush.bf16.msrb.mxu0 %v726_v47  ;;  %461 = vmatpush.bf16.msrb.mxu1 %v790_v50 }
  0x2c   :  { %403 = vmatpush.bf16.msra.mxu3 %v786_v46 }
  0x2d   :  { %374 = vmatpush.bf16.msra.mxu2 %v722_v42 }
  0x2e   :  { %713 = vmatmul.msk.bf16.gmra.mxu0 %vm67_vm1, %v53_v54  ;;  %717 = vmatmul.msk.bf16.gmra.mxu1 %vm67_vm1, %v53_v54  ;;  %v1073_v54 = vperm.slane %v56_v51, 0 }
  0x30   :  { %668 = vmatpush.bf16.msrb.mxu3 %v958_v21 }
  0x31   :  { %639 = vmatpush.bf16.msrb.mxu2 %v950_v20 }
  0x34   :  { %669 = vmatpush.bf16.msrb.mxu3 %v957_v23 }
  0x35   :  { %640 = vmatpush.bf16.msrb.mxu2 %v949_v22 }
  0x38   :  { %670 = vmatpush.bf16.msrb.mxu3 %v956_v25 }
  0x39   :  { %641 = vmatpush.bf16.msrb.mxu2 %v948_v24 }
  0x3c   :  { %671 = vmatpush.bf16.msrb.mxu3 %v955_v33 }
  0x3d   :  { %642 = vmatpush.bf16.msrb.mxu2 %v947_v32 }
  0x3e   :  { %714 = vmatmul.msk.bf16.gmra.mxu0 %vm67_vm1, %v54_v11  ;;  %718 = vmatmul.msk.bf16.gmra.mxu1 %vm67_vm1, %v54_v11 }
  0x40   :  { %672 = vmatpush.bf16.msrb.mxu3 %v954_v41 }
  0x41   :  { %643 = vmatpush.bf16.msrb.mxu2 %v946_v40 }
  0x45   :  { %644 = vmatpush.bf16.msrb.mxu2 %v945_v44 }
  0x8b   :  { %v96_v52 = vpop.f32.mrf.mxu0  ;;  %v125_v53 = vpop.f32.mrf.mxu1 }
  0x8c   :  { %v97_v56 = vadd.f32 %v96_v52, %v1073_v54  ;;  %v126_v57 = vadd.f32 %v125_v53, %v1075_v55 }
  0x8e   :  { %v145_v62 = vmax.f32 %v97_v56, 0.0  ;;  %v146_v63 = vmax.f32 %v126_v57, 0.0 }
  0x93   :  { %v98_v58 = vpop.f32.mrf.mxu0  ;;  %v127_v59 = vpop.f32.mrf.mxu1 }
  0x94   :  { %v99_v60 = vadd.f32 %v98_v58, %v1073_v54  ;;  %v128_v61 = vadd.f32 %v127_v59, %v1075_v55  ;;  %v953_v59 = vld [vmem:[%s1204_s5 + $0x50] sm:$0xff] }
  0x95   :  { %673 = vmatpush.bf16.msrb.mxu3 %v953_v59 }
  0x96   :  { %v147_v0 = vmax.f32 %v99_v60, 0.0  ;;  %v148_v1 = vmax.f32 %v128_v61, 0.0  ;;  %v951_v60 = vld [vmem:[%s1204_s5 + $0x40] sm:$0xff] }
  0x97   :  { %v943_v61 = vld [vmem:[%s1204_s5] sm:$0xff] }
  0x98   :  { %v161_v2 = vpack.c.bf16 %v147_v0, %v145_v62  ;;  %v162_v3 = vpack.c.bf16 %v148_v1, %v146_v63  ;;  %v201_v62 = vld [vmem:[%s1203_s4] sm:$0x3] }
  0x99   :  { %v1144_v1 = vperm.slane %v201_v62, 1 }
  0x9a   :  { %375 = vmatmul.bf16.vlgmr.msra.gmra.mxu2 %v161_v2  ;;  %404 = vmatmul.bf16.vlgmr.msra.gmra.mxu3 %v162_v3 }
  0x9b   :  { %433 = vmatmul.bf16.vlgmr.msrb.gmra.mxu0 %v161_v2  ;;  %462 = vmatmul.bf16.vlgmr.msrb.gmra.mxu1 %v162_v3  ;;  %v101_v4 = vpop.f32.mrf.mxu0  ;;  %v130_v5 = vpop.f32.mrf.mxu1 }
  0x9c   :  { %v102_v6 = vadd.f32 %v101_v4, %v1073_v54  ;;  %v131_v7 = vadd.f32 %v130_v5, %v1075_v55  ;;  %v1147_v5 = vperm.slane %v201_v62, 0 }
  0x9e   :  { %v149_v12 = vmax.f32 %v102_v6, 0.0  ;;  %v150_v13 = vmax.f32 %v131_v7, 0.0 }
  0xa3   :  { %v103_v8 = vpop.f32.mrf.mxu0  ;;  %v132_v9 = vpop.f32.mrf.mxu1 }
  0xa4   :  { %v104_v10 = vadd.f32 %v103_v8, %v1073_v54  ;;  %v133_v11 = vadd.f32 %v132_v9, %v1075_v55 }
  0xa6   :  { %v151_v14 = vmax.f32 %v104_v10, 0.0  ;;  %v152_v15 = vmax.f32 %v133_v11, 0.0 }
  0xa8   :  { %v163_v16 = vpack.c.bf16 %v151_v14, %v149_v12  ;;  %v164_v17 = vpack.c.bf16 %v152_v15, %v150_v13 }
  0xaa   :  { %380 = vmatmul.bf16.gmra.mxu2 %v163_v16  ;;  %409 = vmatmul.bf16.gmra.mxu3 %v164_v17 }
  0xab   :  { %438 = vmatmul.bf16.gmra.mxu0 %v163_v16  ;;  %467 = vmatmul.bf16.gmra.mxu1 %v164_v17  ;;  %v106_v18 = vpop.f32.mrf.mxu0  ;;  %v135_v19 = vpop.f32.mrf.mxu1 }
  0xac   :  { %v107_v26 = vadd.f32 %v106_v18, %v1073_v54  ;;  %v136_v27 = vadd.f32 %v135_v19, %v1075_v55 }
  0xae   :  { %v153_v34 = vmax.f32 %v107_v26, 0.0  ;;  %v154_v35 = vmax.f32 %v136_v27, 0.0 }
  0xb3   :  { %v108_v28 = vpop.f32.mrf.mxu0  ;;  %v137_v29 = vpop.f32.mrf.mxu1 }
  0xb4   :  { %v109_v30 = vadd.f32 %v108_v28, %v1073_v54  ;;  %v138_v31 = vadd.f32 %v137_v29, %v1075_v55 }
  0xb6   :  { %v155_v36 = vmax.f32 %v109_v30, 0.0  ;;  %v156_v37 = vmax.f32 %v138_v31, 0.0 }
  0xb8   :  { %v165_v38 = vpack.c.bf16 %v155_v36, %v153_v34  ;;  %v166_v39 = vpack.c.bf16 %v156_v37, %v154_v35 }
  0xba   :  { %385 = vmatmul.bf16.gmra.mxu2 %v165_v38  ;;  %414 = vmatmul.bf16.gmra.mxu3 %v166_v39 }
  0xbb   :  { %443 = vmatmul.bf16.gmra.mxu0 %v165_v38  ;;  %472 = vmatmul.bf16.gmra.mxu1 %v166_v39  ;;  %v111_v42 = vpop.f32.mrf.mxu0  ;;  %v140_v43 = vpop.f32.mrf.mxu1 }
  0xbc   :  { %v112_v45 = vadd.f32 %v111_v42, %v1073_v54  ;;  %v141_v46 = vadd.f32 %v140_v43, %v1075_v55 }
  0xbe   :  { %v157_v51 = vmax.f32 %v112_v45, 0.0  ;;  %v158_v52 = vmax.f32 %v141_v46, 0.0 }
  0xc3   :  { %v113_v47 = vpop.f32.mrf.mxu0  ;;  %v142_v48 = vpop.f32.mrf.mxu1 }
  0xc4   :  { %v114_v49 = vadd.f32 %v113_v47, %v1073_v54  ;;  %v143_v50 = vadd.f32 %v142_v48, %v1075_v55  ;;  %v952_v54 = vld [vmem:[%s1204_s5 + $0x48] sm:$0xff] }
  0xc5   :  { %v944_v55 = vld [vmem:[%s1204_s5 + $0x8] sm:$0xff]  ;;  %674 = vmatpush.bf16.msrb.mxu3 %v952_v54 }
  0xc6   :  { %v159_v53 = vmax.f32 %v114_v49, 0.0  ;;  %v160_v56 = vmax.f32 %v143_v50, 0.0  ;;  %645 = vmatpush.bf16.msrb.mxu2 %v944_v55 }
  0xc8   :  { %v167_v57 = vpack.c.bf16 %v159_v53, %v157_v51  ;;  %v168_v58 = vpack.c.bf16 %v160_v56, %v158_v52 }
  0xc9   :  { %675 = vmatpush.bf16.msrb.mxu3 %v951_v60 }
  0xca   :  { %390 = vmatmul.bf16.gmra.mxu2 %v167_v57  ;;  %419 = vmatmul.bf16.gmra.mxu3 %v168_v58 }
  0xcb   :  { %448 = vmatmul.bf16.gmra.mxu0 %v167_v57  ;;  %477 = vmatmul.bf16.gmra.mxu1 %v168_v58 }
  0xcc   :  { %646 = vmatpush.bf16.msrb.mxu2 %v943_v61 }
 0x118   :  { %v434_v63 = vpop.f32.mrf.mxu0  ;;  %v463_v0 = vpop.f32.mrf.mxu1 }
 0x119   :  { %v435_v2 = vadd.f32 %v434_v63, %v1144_v1 }
 0x11b   :  { %v464_v8 = vadd.f32 %v463_v0, %v435_v2 }
 0x11d   :  { %v376_v3 = vpop.f32.mrf.mxu2  ;;  %v405_v4 = vpop.f32.mrf.mxu3  ;;  %v484_v12 = vmax.f32 %v464_v8, 0.0 }
 0x11e   :  { %v377_v10 = vadd.f32 %v376_v3, %v1147_v5 }
 0x120   :  { %v436_v6 = vpop.f32.mrf.mxu0  ;;  %v465_v7 = vpop.f32.mrf.mxu1  ;;  %v406_v16 = vadd.f32 %v405_v4, %v377_v10 }
 0x121   :  { %v437_v9 = vadd.f32 %v436_v6, %v1144_v1 }
 0x122   :  { %v483_v22 = vmax.f32 %v406_v16, 0.0 }
 0x123   :  { %v466_v11 = vadd.f32 %v465_v7, %v437_v9 }
 0x125   :  { %v486_v13 = vmax.f32 %v466_v11, 0.0  ;;  %v378_v14 = vpop.f32.mrf.mxu2  ;;  %v407_v15 = vpop.f32.mrf.mxu3 }
 0x126   :  { %v379_v17 = vadd.f32 %v378_v14, %v1147_v5 }
 0x127   :  { %v500_v18 = vpack.c.bf16 %v486_v13, %v484_v12 }
 0x128   :  { %v408_v19 = vadd.f32 %v407_v15, %v379_v17  ;;  %v439_v20 = vpop.f32.mrf.mxu0  ;;  %v468_v21 = vpop.f32.mrf.mxu1 }
 0x129   :  { %676 = vmatmul.bf16.vlgmr.msrb.gmra.mxu3 %v500_v18  ;;  %v440_v25 = vadd.f32 %v439_v20, %v1144_v1 }
 0x12a   :  { %v485_v23 = vmax.f32 %v408_v19, 0.0 }
 0x12b   :  { %v469_v30 = vadd.f32 %v468_v21, %v440_v25 }
 0x12c   :  { %v499_v24 = vpack.c.bf16 %v485_v23, %v483_v22 }
 0x12d   :  { %v381_v26 = vpop.f32.mrf.mxu2  ;;  %v410_v27 = vpop.f32.mrf.mxu3  ;;  %v488_v34 = vmax.f32 %v469_v30, 0.0 }
 0x12e   :  { %647 = vmatmul.bf16.vlgmr.msrb.gmra.mxu2 %v499_v24  ;;  %v382_v32 = vadd.f32 %v381_v26, %v1147_v5 }
 0x130   :  { %v441_v28 = vpop.f32.mrf.mxu0  ;;  %v470_v29 = vpop.f32.mrf.mxu1  ;;  %v411_v38 = vadd.f32 %v410_v27, %v382_v32 }
 0x131   :  { %v442_v31 = vadd.f32 %v441_v28, %v1144_v1 }
 0x132   :  { %v487_v44 = vmax.f32 %v411_v38, 0.0 }
 0x133   :  { %v471_v33 = vadd.f32 %v470_v29, %v442_v31 }
 0x135   :  { %v490_v35 = vmax.f32 %v471_v33, 0.0  ;;  %v383_v36 = vpop.f32.mrf.mxu2  ;;  %v412_v37 = vpop.f32.mrf.mxu3 }
 0x136   :  { %v384_v39 = vadd.f32 %v383_v36, %v1147_v5 }
 0x137   :  { %v502_v40 = vpack.c.bf16 %v490_v35, %v488_v34 }
 0x138   :  { %v413_v41 = vadd.f32 %v412_v37, %v384_v39  ;;  %v444_v42 = vpop.f32.mrf.mxu0  ;;  %v473_v43 = vpop.f32.mrf.mxu1 }
 0x139   :  { %681 = vmatmul.bf16.gmra.mxu3 %v502_v40  ;;  %v445_v47 = vadd.f32 %v444_v42, %v1144_v1 }
 0x13a   :  { %v489_v45 = vmax.f32 %v413_v41, 0.0 }
 0x13b   :  { %v474_v52 = vadd.f32 %v473_v43, %v445_v47 }
 0x13c   :  { %v501_v46 = vpack.c.bf16 %v489_v45, %v487_v44 }
 0x13d   :  { %v386_v48 = vpop.f32.mrf.mxu2  ;;  %v415_v49 = vpop.f32.mrf.mxu3  ;;  %v492_v58 = vmax.f32 %v474_v52, 0.0 }
 0x13e   :  { %652 = vmatmul.bf16.gmra.mxu2 %v501_v46  ;;  %v387_v56 = vadd.f32 %v386_v48, %v1147_v5 }
 0x140   :  { %v446_v50 = vpop.f32.mrf.mxu0  ;;  %v475_v51 = vpop.f32.mrf.mxu1  ;;  %v416_v60 = vadd.f32 %v415_v49, %v387_v56 }
 0x141   :  { %v447_v53 = vadd.f32 %v446_v50, %v1144_v1 }
 0x142   :  { %v491_v3 = vmax.f32 %v416_v60, 0.0 }
 0x143   :  { %v476_v57 = vadd.f32 %v475_v51, %v447_v53 }
 0x145   :  { %v494_v59 = vmax.f32 %v476_v57, 0.0  ;;  %v388_v54 = vpop.f32.mrf.mxu2  ;;  %v417_v55 = vpop.f32.mrf.mxu3 }
 0x146   :  { %v389_v61 = vadd.f32 %v388_v54, %v1147_v5 }
 0x147   :  { %v504_v62 = vpack.c.bf16 %v494_v59, %v492_v58 }
 0x148   :  { %v418_v63 = vadd.f32 %v417_v55, %v389_v61  ;;  %v449_v0 = vpop.f32.mrf.mxu0  ;;  %v478_v2 = vpop.f32.mrf.mxu1 }
 0x149   :  { %686 = vmatmul.bf16.gmra.mxu3 %v504_v62  ;;  %v450_v7 = vadd.f32 %v449_v0, %v1144_v1 }
 0x14a   :  { %v493_v4 = vmax.f32 %v418_v63, 0.0 }
 0x14b   :  { %v479_v11 = vadd.f32 %v478_v2, %v450_v7 }
 0x14c   :  { %v503_v6 = vpack.c.bf16 %v493_v4, %v491_v3 }
 0x14d   :  { %v391_v8 = vpop.f32.mrf.mxu2  ;;  %v420_v9 = vpop.f32.mrf.mxu3  ;;  %v496_v16 = vmax.f32 %v479_v11, 0.0 }
 0x14e   :  { %657 = vmatmul.bf16.gmra.mxu2 %v503_v6  ;;  %v392_v13 = vadd.f32 %v391_v8, %v1147_v5 }
 0x150   :  { %v451_v10 = vpop.f32.mrf.mxu0  ;;  %v480_v14 = vpop.f32.mrf.mxu1  ;;  %v421_v19 = vadd.f32 %v420_v9, %v392_v13 }
 0x151   :  { %v452_v12 = vadd.f32 %v451_v10, %v1144_v1  ;;  %v962_v1 = vld [vmem:[%s1205_s6] ss:$0 sm:$0xff] }
 0x152   :  { %v495_v24 = vmax.f32 %v421_v19, 0.0 }
 0x153   :  { %v481_v15 = vadd.f32 %v480_v14, %v452_v12 }
 0x155   :  { %v498_v17 = vmax.f32 %v481_v15, 0.0  ;;  %v393_v18 = vpop.f32.mrf.mxu2  ;;  %v422_v21 = vpop.f32.mrf.mxu3 }
 0x156   :  { %v394_v20 = vadd.f32 %v393_v18, %v1147_v5 }
 0x157   :  { %v506_v22 = vpack.c.bf16 %v498_v17, %v496_v16 }
 0x158   :  { %v423_v23 = vadd.f32 %v422_v21, %v394_v20 }
 0x159   :  { %691 = vmatmul.bf16.gmra.mxu3 %v506_v22 }
 0x15a   :  { %v497_v25 = vmax.f32 %v423_v23, 0.0 }
 0x15c   :  { %v505_v26 = vpack.c.bf16 %v497_v25, %v495_v24 }
 0x15e   :  { %662 = vmatmul.bf16.gmra.mxu2 %v505_v26 }
 0x1ac   :  { %v677_v27 = vpop.f32.mrf.mxu3 }
 0x1b1   :  { %v648_v28 = vpop.f32.mrf.mxu2 }
 0x1b2   :  { %v649_v29 = vadd.f32 %v962_v1, %v648_v28 }
 0x1b4   :  { %v678_v30 = vadd.f32 %v677_v27, %v649_v29  ;;  %v679_v31 = vpop.f32.mrf.mxu3 }
 0x1b6   :  { %698 = vst.msk [vmem:[%s1206_s7] sm:$0xff] %vm697_vm2, %v678_v30 }
 0x1b9   :  { %v650_v5 = vpop.f32.mrf.mxu2 }
 0x1ba   :  { %v651_v32 = vadd.f32 %v962_v1, %v650_v5 }
 0x1bc   :  { %v680_v33 = vadd.f32 %v679_v31, %v651_v32  ;;  %v682_v34 = vpop.f32.mrf.mxu3 }
 0x1be   :  { %699 = vst.msk [vmem:[%s1206_s7 + $0x8] sm:$0xff] %vm697_vm2, %v680_v33 }
 0x1c1   :  { %v653_v35 = vpop.f32.mrf.mxu2 }
 0x1c2   :  { %v654_v36 = vadd.f32 %v962_v1, %v653_v35 }
 0x1c4   :  { %v683_v37 = vadd.f32 %v682_v34, %v654_v36  ;;  %v684_v38 = vpop.f32.mrf.mxu3 }
 0x1c6   :  { %700 = vst.msk [vmem:[%s1206_s7 + $0x10] sm:$0xff] %vm697_vm2, %v683_v37 }
 0x1c9   :  { %v655_v39 = vpop.f32.mrf.mxu2 }
 0x1ca   :  { %v656_v40 = vadd.f32 %v962_v1, %v655_v39 }
 0x1cc   :  { %v685_v41 = vadd.f32 %v684_v38, %v656_v40  ;;  %v687_v42 = vpop.f32.mrf.mxu3 }
 0x1ce   :  { %701 = vst.msk [vmem:[%s1206_s7 + $0x18] sm:$0xff] %vm697_vm2, %v685_v41 }
 0x1d1   :  { %v658_v43 = vpop.f32.mrf.mxu2 }
 0x1d2   :  { %v659_v44 = vadd.f32 %v962_v1, %v658_v43 }
 0x1d4   :  { %v688_v45 = vadd.f32 %v687_v42, %v659_v44  ;;  %v689_v46 = vpop.f32.mrf.mxu3 }
 0x1d6   :  { %702 = vst.msk [vmem:[%s1206_s7 + $0x20] sm:$0xff] %vm697_vm2, %v688_v45 }
 0x1d9   :  { %v660_v47 = vpop.f32.mrf.mxu2 }
 0x1da   :  { %v661_v48 = vadd.f32 %v962_v1, %v660_v47 }
 0x1dc   :  { %v690_v49 = vadd.f32 %v689_v46, %v661_v48  ;;  %v692_v50 = vpop.f32.mrf.mxu3 }
 0x1de   :  { %703 = vst.msk [vmem:[%s1206_s7 + $0x28] sm:$0xff] %vm697_vm2, %v690_v49 }
 0x1e1   :  { %v663_v51 = vpop.f32.mrf.mxu2 }
 0x1e2   :  { %v664_v52 = vadd.f32 %v962_v1, %v663_v51 }
 0x1e4   :  { %v693_v53 = vadd.f32 %v692_v50, %v664_v52  ;;  %v694_v58 = vpop.f32.mrf.mxu3 }
 0x1e6   :  { %704 = vst.msk [vmem:[%s1206_s7 + $0x30] sm:$0xff] %vm697_vm2, %v693_v53 }
 0x1e9   :  { %v665_v56 = vpop.f32.mrf.mxu2 }
 0x1ea   :  { %v666_v57 = vadd.f32 %v962_v1, %v665_v56 }
 0x1ec   :  { %v695_v59 = vadd.f32 %v694_v58, %v666_v57 }
 0x1ee   :  { %705 = vst.msk [vmem:[%s1206_s7 + $0x38] sm:$0xff] %vm697_vm2, %v695_v59 }
 0x1ef   :  { %710 = vsyncpa [#allocation3], 1 }

</bundles_post_ra>
